<compile_context>
chip_gen: v6e
topology: v6e:2x2x1
jax: 0.10.0
libtpu: 0.0.40
codegen_flags: <defaults>
</compile_context>

<pallas_src>
import jax
import jax.numpy as jnp
from jax.experimental import pallas as pl
from jax.experimental.pallas import tpu as pltpu


# -------- tunables --------------------------------------------------------
_MAX_CHUNKS = 8                 # max concurrently in-flight DMAs per operand
_MIN_CHUNK_BYTES = 256 * 1024   # don't split below ~256 KiB per DMA
_COL_ALIGN = 128                # lane-friendly column-chunk granularity
_MIN_STRIDED_ROW_BYTES = 512    # below ~1 HBM burst per row -> prefer XLA
_SUB_BYTE_DTYPES = ("int4", "uint4", "float4_e2m1fn")


def _chunks_1d(total, n, align=1):
    """Split [0, total) into <= n static (start, size) pieces.

    Sizes are multiples of `align` except possibly the last piece.
    """
    if total <= 0:
        return []
    n = max(1, min(n, -(-total // align)))
    base = -(-total // n)                # ceil(total / n)
    base = -(-base // align) * align     # round size up to multiple of align
    out = []
    start = 0
    while start < total:
        size = min(base, total - start)
        out.append((start, size))
        start += size
    return out


def _operand_chunks(b, w, n_chunks):
    """Static ((row_start, rows), (col_start, cols)) chunks covering (b, w)."""
    if b == 1:
        # Contiguous fast path: each column chunk of the single row is one
        # contiguous burst — no per-row descriptor overhead.
        return [((0, 1), c) for c in _chunks_1d(w, n_chunks, align=_COL_ALIGN)]
    # B > 1: chunk along rows; each chunk is a contiguous block of full rows.
    return [(r, (0, w)) for r in _chunks_1d(b, n_chunks, align=1)]


def _build_flatcat_kernel(nx, x_chunks, y_chunks):
    """Kernel closure over static chunk descriptors.

    All chunk starts/sizes are Python ints (trace-time constants), so every
    DMA has a static shape; all copies are started before any wait so they
    overlap; source and destination regions of distinct chunks are disjoint.
    """
    n_sems = len(x_chunks) + len(y_chunks)

    def kernel(x_hbm, y_hbm, o_hbm, sem):
        copies = []
        j = 0
        for (r0, rn), (c0, cn) in x_chunks:
            cp = pltpu.make_async_copy(
                x_hbm.at[pl.ds(r0, rn), pl.ds(c0, cn)],
                o_hbm.at[pl.ds(r0, rn), pl.ds(c0, cn)],
                sem.at[j])
            cp.start()
            copies.append(cp)
            j += 1
        for (r0, rn), (c0, cn) in y_chunks:
            cp = pltpu.make_async_copy(
                y_hbm.at[pl.ds(r0, rn), pl.ds(c0, cn)],
                o_hbm.at[pl.ds(r0, rn), pl.ds(nx + c0, cn)],
                sem.at[j])
            cp.start()
            copies.append(cp)
            j += 1
        for cp in copies:
            cp.wait()

    return kernel, n_sems


def flat_cat(x, y, *, min_pallas_bytes=1 << 20, num_chunks=None, use_pallas=None):
    """x: (B, Cx, Hx, Wx), y: (B, Cy, Hy, Wy) -> (B, Nx+Ny, 1, 1).

    min_pallas_bytes: below this total traffic, use XLA's fused concatenate
      (pallas_call launch + DMA-setup overhead dominates tiny copies).
    num_chunks: override number of concurrent DMA chunks per operand.
    use_pallas: force (True) or forbid (False) the Pallas DMA path; None=auto.
    """
    assert x.shape[0] == y.shape[0], "batch dims must match"
    assert x.dtype == y.dtype, "dtypes must match (torch.cat requirement)"
    b = x.shape[0]

    # Glue: flatten everything after batch (equivalent to .view(B, -1, 1, 1)).
    x_flat = x.reshape(b, -1)
    y_flat = y.reshape(b, -1)
    nx = x_flat.shape[1]
    ny = y_flat.shape[1]
    n_out = nx + ny

    def _xla_path():
        return jnp.concatenate([x_flat, y_flat], axis=1).reshape(b, n_out, 1, 1)

    dt = jnp.dtype(x.dtype)
    itemsize = dt.itemsize

    # Correctness guards: empty operands / zero batch (no 0-extent DMA
    # descriptors) and sub-byte dtypes (column offset may not be byte-aligned).
    if b == 0 or nx == 0 or ny == 0 or dt.name in _SUB_BYTE_DTYPES:
        return _xla_path()

    total_bytes = 2 * b * n_out * itemsize  # read once + write once
    if use_pallas is None:
        min_row_bytes = min(nx, ny) * itemsize
        use_pallas = (total_bytes >= min_pallas_bytes
                      and (b == 1 or min_row_bytes >= _MIN_STRIDED_ROW_BYTES))
    if not use_pallas:
        return _xla_path()

    def _auto_chunks(width):
        op_bytes = b * width * itemsize
        return max(1, min(_MAX_CHUNKS, op_bytes // _MIN_CHUNK_BYTES))

    ncx = num_chunks if num_chunks is not None else _auto_chunks(nx)
    ncy = num_chunks if num_chunks is not None else _auto_chunks(ny)
    x_chunks = _operand_chunks(b, nx, ncx)
    y_chunks = _operand_chunks(b, ny, ncy)

    kernel, n_sems = _build_flatcat_kernel(nx, x_chunks, y_chunks)

    out_flat = pl.pallas_call(
        kernel,
        out_shape=jax.ShapeDtypeStruct((b, n_out), x.dtype),
        in_specs=[
            pl.BlockSpec(memory_space=pl.ANY),
            pl.BlockSpec(memory_space=pl.ANY),
        ],
        out_specs=pl.BlockSpec(memory_space=pl.ANY),
        scratch_shapes=[pltpu.SemaphoreType.DMA((n_sems,))],
        # Advisory: zero flops, pure memory-bound copy.
        cost_estimate=pl.CostEstimate(
            flops=0, transcendentals=0, bytes_accessed=total_bytes),
    )(x_flat, y_flat)

    return out_flat.reshape(b, n_out, 1, 1)


if __name__ == "__main__":
    key = jax.random.PRNGKey(0)
    kx, ky = jax.random.split(key)

    # Small NCHW inputs (different spatial sizes to exercise flatten + cat).
    x = jax.random.normal(kx, (2, 4, 16, 16), dtype=jnp.float32)
    y = jax.random.normal(ky, (2, 4, 8, 8), dtype=jnp.float32)

    ref = jnp.concatenate(
        [x.reshape(x.shape[0], -1, 1, 1), y.reshape(y.shape[0], -1, 1, 1)],
        axis=1,
    )

    # 1) Forced Pallas DMA path, B > 1: row-chunked concurrent copies.
    out = flat_cat(x, y, use_pallas=True, num_chunks=2)
    jax.block_until_ready(out)
    assert out.shape == ref.shape, (out.shape, ref.shape)
    assert jnp.array_equal(out, ref), "mismatch vs reference (B>1 path)"

    # 2) Forced Pallas DMA path, B == 1: contiguous column-chunked fast path.
    x1, y1 = x[:1], y[:1]
    ref1 = jnp.concatenate(
        [x1.reshape(1, -1, 1, 1), y1.reshape(1, -1, 1, 1)], axis=1)
    out1 = flat_cat(x1, y1, use_pallas=True, num_chunks=4)
    jax.block_until_ready(out1)
    assert jnp.array_equal(out1, ref1), "mismatch vs reference (B==1 path)"

    # 3) Auto heuristic: these tiny slabs fall back to XLA's fused concat.
    out_auto = flat_cat(x, y)
    jax.block_until_ready(out_auto)
    assert jnp.array_equal(out_auto, ref), "mismatch vs reference (auto path)"

    print("KERNEL_OK")
</pallas_src>

<mosaic_0001>
module attributes {stable_mosaic.version = 11 : i64} {
  func.func @kernel(%arg0: memref<2x1024xf32, #tpu.memory_space<any>>, %arg1: memref<2x256xf32, #tpu.memory_space<any>>, %arg2: memref<2x1280xf32, #tpu.memory_space<any>>, %arg3: memref<4x!tpu.dma_semaphore, #tpu.memory_space<semaphore_mem>>) attributes {dimension_semantics = [], scalar_prefetch = 0 : i64, scratch_operands = 1 : i64, tpu.core_type = #tpu.core_type<tc>} {
    %c0_i32 = arith.constant 0 : i32
    %c0_i32_0 = arith.constant 0 : i32
    %c0_i32_1 = arith.constant 0 : i32
    %0 = tpu.memref_slice %arg0[%c0_i32_0, %c0_i32_1] : memref<2x1024xf32, #tpu.memory_space<any>> -> memref<1x1024xf32, #tpu.memory_space<any>>
    %c0_i32_2 = arith.constant 0 : i32
    %c0_i32_3 = arith.constant 0 : i32
    %1 = tpu.memref_slice %arg2[%c0_i32_2, %c0_i32_3] : memref<2x1280xf32, #tpu.memory_space<any>> -> memref<1x1024xf32, #tpu.memory_space<any>>
    %2 = tpu.memref_slice %arg3[%c0_i32] : memref<4x!tpu.dma_semaphore, #tpu.memory_space<semaphore_mem>> -> memref<1x!tpu.dma_semaphore, #tpu.memory_space<semaphore_mem>>
    %3 = tpu.memref_squeeze %2 : memref<1x!tpu.dma_semaphore, #tpu.memory_space<semaphore_mem>> -> memref<!tpu.dma_semaphore, #tpu.memory_space<semaphore_mem>>
    tpu.enqueue_dma source(%0 : memref<1x1024xf32, #tpu.memory_space<any>>) target(%1 : memref<1x1024xf32, #tpu.memory_space<any>>) target_semaphore(%3 : memref<!tpu.dma_semaphore, #tpu.memory_space<semaphore_mem>>)
    %c1_i32 = arith.constant 1 : i32
    %c1_i32_4 = arith.constant 1 : i32
    %c0_i32_5 = arith.constant 0 : i32
    %4 = tpu.memref_slice %arg0[%c1_i32_4, %c0_i32_5] : memref<2x1024xf32, #tpu.memory_space<any>> -> memref<1x1024xf32, #tpu.memory_space<any>>
    %c1_i32_6 = arith.constant 1 : i32
    %c0_i32_7 = arith.constant 0 : i32
    %5 = tpu.memref_slice %arg2[%c1_i32_6, %c0_i32_7] : memref<2x1280xf32, #tpu.memory_space<any>> -> memref<1x1024xf32, #tpu.memory_space<any>>
    %6 = tpu.memref_slice %arg3[%c1_i32] : memref<4x!tpu.dma_semaphore, #tpu.memory_space<semaphore_mem>> -> memref<1x!tpu.dma_semaphore, #tpu.memory_space<semaphore_mem>>
    %7 = tpu.memref_squeeze %6 : memref<1x!tpu.dma_semaphore, #tpu.memory_space<semaphore_mem>> -> memref<!tpu.dma_semaphore, #tpu.memory_space<semaphore_mem>>
    tpu.enqueue_dma source(%4 : memref<1x1024xf32, #tpu.memory_space<any>>) target(%5 : memref<1x1024xf32, #tpu.memory_space<any>>) target_semaphore(%7 : memref<!tpu.dma_semaphore, #tpu.memory_space<semaphore_mem>>)
    %c2_i32 = arith.constant 2 : i32
    %c0_i32_8 = arith.constant 0 : i32
    %c0_i32_9 = arith.constant 0 : i32
    %8 = tpu.memref_slice %arg1[%c0_i32_8, %c0_i32_9] : memref<2x256xf32, #tpu.memory_space<any>> -> memref<1x256xf32, #tpu.memory_space<any>>
    %c0_i32_10 = arith.constant 0 : i32
    %c1024_i32 = arith.constant 1024 : i32
    %9 = tpu.memref_slice %arg2[%c0_i32_10, %c1024_i32] : memref<2x1280xf32, #tpu.memory_space<any>> -> memref<1x256xf32, #tpu.memory_space<any>>
    %10 = tpu.memref_slice %arg3[%c2_i32] : memref<4x!tpu.dma_semaphore, #tpu.memory_space<semaphore_mem>> -> memref<1x!tpu.dma_semaphore, #tpu.memory_space<semaphore_mem>>
    %11 = tpu.memref_squeeze %10 : memref<1x!tpu.dma_semaphore, #tpu.memory_space<semaphore_mem>> -> memref<!tpu.dma_semaphore, #tpu.memory_space<semaphore_mem>>
    tpu.enqueue_dma source(%8 : memref<1x256xf32, #tpu.memory_space<any>>) target(%9 : memref<1x256xf32, #tpu.memory_space<any>>) target_semaphore(%11 : memref<!tpu.dma_semaphore, #tpu.memory_space<semaphore_mem>>)
    %c3_i32 = arith.constant 3 : i32
    %c1_i32_11 = arith.constant 1 : i32
    %c0_i32_12 = arith.constant 0 : i32
    %12 = tpu.memref_slice %arg1[%c1_i32_11, %c0_i32_12] : memref<2x256xf32, #tpu.memory_space<any>> -> memref<1x256xf32, #tpu.memory_space<any>>
    %c1_i32_13 = arith.constant 1 : i32
    %c1024_i32_14 = arith.constant 1024 : i32
    %13 = tpu.memref_slice %arg2[%c1_i32_13, %c1024_i32_14] : memref<2x1280xf32, #tpu.memory_space<any>> -> memref<1x256xf32, #tpu.memory_space<any>>
    %14 = tpu.memref_slice %arg3[%c3_i32] : memref<4x!tpu.dma_semaphore, #tpu.memory_space<semaphore_mem>> -> memref<1x!tpu.dma_semaphore, #tpu.memory_space<semaphore_mem>>
    %15 = tpu.memref_squeeze %14 : memref<1x!tpu.dma_semaphore, #tpu.memory_space<semaphore_mem>> -> memref<!tpu.dma_semaphore, #tpu.memory_space<semaphore_mem>>
    tpu.enqueue_dma source(%12 : memref<1x256xf32, #tpu.memory_space<any>>) target(%13 : memref<1x256xf32, #tpu.memory_space<any>>) target_semaphore(%15 : memref<!tpu.dma_semaphore, #tpu.memory_space<semaphore_mem>>)
    %c0_i32_15 = arith.constant 0 : i32
    %c0_i32_16 = arith.constant 0 : i32
    %c0_i32_17 = arith.constant 0 : i32
    %16 = tpu.memref_slice %arg0[%c0_i32_16, %c0_i32_17] : memref<2x1024xf32, #tpu.memory_space<any>> -> memref<1x1024xf32, #tpu.memory_space<any>>
    %c0_i32_18 = arith.constant 0 : i32
    %c0_i32_19 = arith.constant 0 : i32
    %17 = tpu.memref_slice %arg2[%c0_i32_18, %c0_i32_19] : memref<2x1280xf32, #tpu.memory_space<any>> -> memref<1x1024xf32, #tpu.memory_space<any>>
    %18 = tpu.memref_slice %arg3[%c0_i32_15] : memref<4x!tpu.dma_semaphore, #tpu.memory_space<semaphore_mem>> -> memref<1x!tpu.dma_semaphore, #tpu.memory_space<semaphore_mem>>
    %19 = tpu.memref_squeeze %18 : memref<1x!tpu.dma_semaphore, #tpu.memory_space<semaphore_mem>> -> memref<!tpu.dma_semaphore, #tpu.memory_space<semaphore_mem>>
    tpu.wait_dma2 semaphore(%19 : memref<!tpu.dma_semaphore, #tpu.memory_space<semaphore_mem>>) src(%16 : memref<1x1024xf32, #tpu.memory_space<any>>) dst(%17 : memref<1x1024xf32, #tpu.memory_space<any>>)
    %c1_i32_20 = arith.constant 1 : i32
    %c1_i32_21 = arith.constant 1 : i32
    %c0_i32_22 = arith.constant 0 : i32
    %20 = tpu.memref_slice %arg0[%c1_i32_21, %c0_i32_22] : memref<2x1024xf32, #tpu.memory_space<any>> -> memref<1x1024xf32, #tpu.memory_space<any>>
    %c1_i32_23 = arith.constant 1 : i32
    %c0_i32_24 = arith.constant 0 : i32
    %21 = tpu.memref_slice %arg2[%c1_i32_23, %c0_i32_24] : memref<2x1280xf32, #tpu.memory_space<any>> -> memref<1x1024xf32, #tpu.memory_space<any>>
    %22 = tpu.memref_slice %arg3[%c1_i32_20] : memref<4x!tpu.dma_semaphore, #tpu.memory_space<semaphore_mem>> -> memref<1x!tpu.dma_semaphore, #tpu.memory_space<semaphore_mem>>
    %23 = tpu.memref_squeeze %22 : memref<1x!tpu.dma_semaphore, #tpu.memory_space<semaphore_mem>> -> memref<!tpu.dma_semaphore, #tpu.memory_space<semaphore_mem>>
    tpu.wait_dma2 semaphore(%23 : memref<!tpu.dma_semaphore, #tpu.memory_space<semaphore_mem>>) src(%20 : memref<1x1024xf32, #tpu.memory_space<any>>) dst(%21 : memref<1x1024xf32, #tpu.memory_space<any>>)
    %c2_i32_25 = arith.constant 2 : i32
    %c0_i32_26 = arith.constant 0 : i32
    %c0_i32_27 = arith.constant 0 : i32
    %24 = tpu.memref_slice %arg1[%c0_i32_26, %c0_i32_27] : memref<2x256xf32, #tpu.memory_space<any>> -> memref<1x256xf32, #tpu.memory_space<any>>
    %c0_i32_28 = arith.constant 0 : i32
    %c1024_i32_29 = arith.constant 1024 : i32
    %25 = tpu.memref_slice %arg2[%c0_i32_28, %c1024_i32_29] : memref<2x1280xf32, #tpu.memory_space<any>> -> memref<1x256xf32, #tpu.memory_space<any>>
    %26 = tpu.memref_slice %arg3[%c2_i32_25] : memref<4x!tpu.dma_semaphore, #tpu.memory_space<semaphore_mem>> -> memref<1x!tpu.dma_semaphore, #tpu.memory_space<semaphore_mem>>
    %27 = tpu.memref_squeeze %26 : memref<1x!tpu.dma_semaphore, #tpu.memory_space<semaphore_mem>> -> memref<!tpu.dma_semaphore, #tpu.memory_space<semaphore_mem>>
    tpu.wait_dma2 semaphore(%27 : memref<!tpu.dma_semaphore, #tpu.memory_space<semaphore_mem>>) src(%24 : memref<1x256xf32, #tpu.memory_space<any>>) dst(%25 : memref<1x256xf32, #tpu.memory_space<any>>)
    %c3_i32_30 = arith.constant 3 : i32
    %c1_i32_31 = arith.constant 1 : i32
    %c0_i32_32 = arith.constant 0 : i32
    %28 = tpu.memref_slice %arg1[%c1_i32_31, %c0_i32_32] : memref<2x256xf32, #tpu.memory_space<any>> -> memref<1x256xf32, #tpu.memory_space<any>>
    %c1_i32_33 = arith.constant 1 : i32
    %c1024_i32_34 = arith.constant 1024 : i32
    %29 = tpu.memref_slice %arg2[%c1_i32_33, %c1024_i32_34] : memref<2x1280xf32, #tpu.memory_space<any>> -> memref<1x256xf32, #tpu.memory_space<any>>
    %30 = tpu.memref_slice %arg3[%c3_i32_30] : memref<4x!tpu.dma_semaphore, #tpu.memory_space<semaphore_mem>> -> memref<1x!tpu.dma_semaphore, #tpu.memory_space<semaphore_mem>>
    %31 = tpu.memref_squeeze %30 : memref<1x!tpu.dma_semaphore, #tpu.memory_space<semaphore_mem>> -> memref<!tpu.dma_semaphore, #tpu.memory_space<semaphore_mem>>
    tpu.wait_dma2 semaphore(%31 : memref<!tpu.dma_semaphore, #tpu.memory_space<semaphore_mem>>) src(%28 : memref<1x256xf32, #tpu.memory_space<any>>) dst(%29 : memref<1x256xf32, #tpu.memory_space<any>>)
    return
  }
}

</mosaic_0001>

<bundles_post_ra>
// kernel: tpu_custom_call.1
= control target key start
LH: loop header
LB: loop body
LE: loop exit
PB: predicated region body
PF: predicated region fallthrough
CT: control target
= control target key end

     0   :  { %s124_s9 = smov 32   ;;  %s125_s10 = smov 1   ;;  %s171_s0 = inlined_call_operand.hbm [shape: f32[2,1024], index: 0, kind: input, shape index: {}]   ;;  %s172_s1 = inlined_call_operand.hbm [shape: f32[2,256], index: 1, kind: input, shape index: {}]   ;;  %s173_s2 = inlined_call_operand.hbm [shape: f32[2,1280], index: 2, kind: output, shape index: {}]  }
   0x1   :  { %13 = sst [smem:[#allocation4]] %s124_s9  ;;  %s126_s11 = smov [#allocation2]  }
   0x2   :  { %15 = sst [smem:[#allocation4 + $0x1]] %s124_s9  ;;  %s127_s12 = smov 131072  }
   0x3   :  { %17 = sst [smem:[#allocation4 + $0x2]] %s125_s10  ;;  %s128_s13 = smov 0  }
   0x4   :  { %19 = dma.general %s171_s0, 128, %s173_s2, %s126_s11, %s127_s12, [#allocation4], %s128_s13, 0  }
   0x5   :  { %29 = sst [smem:[#allocation6]] %s124_s9  ;;  %s20_s20 = scalar_lea.hbm %s171_s0, 16 }
   0x6   :  { %31 = sst [smem:[#allocation6 + $0x1]] %s124_s9  ;;  %s21_s23 = scalar_lea.hbm %s173_s2, 16 }
   0x7   :  { %33 = sst [smem:[#allocation6 + $0x2]] %s125_s10  ;;  %s129_s24 = smov [#allocation2 + $0x1]  }
   0x8   :  { %35 = dma.general %s20_s20, 128, %s21_s23, %s129_s24, %s127_s12, [#allocation6], %s128_s13, 0  }
   0x9   :  { %44 = sst [smem:[#allocation8]] %s124_s9  ;;  %s36_s27 = scalar_lea.hbm %s173_s2, 256 }
   0xa   :  { %46 = sst [smem:[#allocation8 + $0x1]] %s124_s9  ;;  %s51_s30 = scalar_lea.hbm %s172_s1, 16 }
   0xb   :  { %48 = sst [smem:[#allocation8 + $0x2]] %s125_s10  ;;  %s130_s0 = smov [#allocation2 + $0x2]  }
   0xc   :  { %50 = dma.general %s172_s1, 32, %s36_s27, %s130_s0, %s127_s12, [#allocation8], %s128_s13, 0  }
   0xd   :  { %60 = sst [smem:[#allocation10]] %s124_s9  ;;  %s52_s7 = scalar_lea.hbm %s173_s2, 272 }
   0xe   :  { %62 = sst [smem:[#allocation10 + $0x1]] %s124_s9  ;;  %s131_s8 = smov [#allocation2 + $0x3]  }
   0xf   :  { %64 = sst [smem:[#allocation10 + $0x2]] %s125_s10 }
  0x10   :  { %66 = dma.general %s51_s30, 32, %s52_s7, %s131_s8, %s127_s12, [#allocation10], %s128_s13, 0  }
  0x11   :  { %116 = dma.done.wait [#allocation2], 128 }
  0x12   :  { %117 = vsyncadd [#allocation2], 4294967168 }
  0x13   :  { %118 = dma.done.wait [#allocation2 + $0x1], 128 }
  0x14   :  { %119 = vsyncadd [#allocation2 + $0x1], 4294967168 }
  0x15   :  { %120 = dma.done.wait [#allocation2 + $0x2], 32 }
  0x16   :  { %121 = vsyncadd [#allocation2 + $0x2], 4294967264 }
  0x17   :  { %122 = dma.done.wait [#allocation2 + $0x3], 32 }
  0x18   :  { %123 = vsyncadd [#allocation2 + $0x3], 4294967264 }
  0x19   :  { %77 = vsyncmov [#allocation2] }
  0x1c   :  { %s78_s11 = vpop.sfrf %77 }
  0x1d   :  { %p104_p0 = scmp.ne.s32.totalorder %s78_s11, 0 }
  0x1f   :  { %82 = shalt.err (%p104_p0)  }
  0x20   :  { %84 = vsyncmov [#allocation2 + $0x1] }
  0x23   :  { %s85_s1 = vpop.sfrf %84 }
  0x24   :  { %p105_p1 = scmp.ne.s32.totalorder %s85_s1, 0 }
  0x26   :  { %89 = shalt.err (%p105_p1)  }
  0x27   :  { %91 = vsyncmov [#allocation2 + $0x2] }
  0x2a   :  { %s92_s2 = vpop.sfrf %91 }
  0x2b   :  { %p106_p2 = scmp.ne.s32.totalorder %s92_s2, 0 }
  0x2d   :  { %96 = shalt.err (%p106_p2)  }
  0x2e   :  { %98 = vsyncmov [#allocation2 + $0x3] }
  0x31   :  { %s99_s9 = vpop.sfrf %98 }
  0x32   :  { %p107_p3 = scmp.ne.s32.totalorder %s99_s9, 0 }
  0x34   :  { %103 = shalt.err (%p107_p3)  }

</bundles_post_ra>
